<compile_context>
chip_gen: v5e
topology: v5e:2x2
jax: 0.10.0
libtpu: 0.0.40
codegen_flags: <defaults>
</compile_context>

<pallas_src>
import functools

import jax
import jax.numpy as jnp
from jax import lax
from jax.experimental import pallas as pl
from jax.experimental.pallas import tpu as pltpu

IN_FEATURES = 8 * 4 ** 3   # 512
HIDDEN = 32
OUT_FEATURES = 1
LEAK = 0.2

# Default batch tile (rows of x per grid step).
# f32 x-tile = 4096*512*4 B = 8 MiB; double-buffered -> 16 MiB.  At ~3.2 TB/s
# (v7x) an 8 MiB tile drains in ~2.6 us, so the ~0.35 us fixed per-grid-step
# cost drops under ~15% (vs ~35% at TB=1024); on v6e/v5e it is a few percent.
# Total VMEM (x double-buffer + lane-dense out + weights) ~ 17 MiB, inside
# v7x's 64 MiB physical VMEM with headroom; v5e/v6e (128 MiB) can raise
# block_b further (8192) at call time.
DEFAULT_BLOCK_B = 4096


def _subclf_kernel(x_ref, w1_ref, b1_ref, w2_ref, b2_ref, o_ref):
    # fc1: (TB, 512) @ (512, 32) -> MXU, f32 accumulate.  x/w1 may arrive in
    # bf16 (halves the HBM read of x, the only real cost of this kernel) —
    # the *producer* must hand off bf16; casting f32->bf16 in the wrapper
    # would not save any HBM traffic.
    x = x_ref[...]
    h = jnp.dot(x, w1_ref[...], preferred_element_type=jnp.float32) + b1_ref[...]
    # LeakyReLU(0.2)
    h = jnp.where(h > 0, h, LEAK * h)
    # fc2 as (1, 32) x (TB, 32)^T -> (1, TB) on the MXU (dot_general with the
    # rhs contracted on its last dim, flash-attention style).  This produces
    # the result directly in a lane-dense row layout: no (TB, 1) column, no
    # ~TB/8 masked vst.msk stores, and the VMEM output buffer shrinks from
    # TB*512 B (lane-padded to 128) to ~8*TB*4 B.  MXU has full slack here.
    y = lax.dot_general(
        w2_ref[...], h,
        dimension_numbers=(((1,), (1,)), ((), ())),
        preferred_element_type=jnp.float32) + b2_ref[...]
    # Sigmoid: exp() goes to the EUP (free slot); the divide stays on the
    # VALU and is fully hidden under the x DMA.
    o_ref[...] = (1.0 / (1.0 + jnp.exp(-y))).reshape(o_ref.shape)


@functools.partial(jax.jit, static_argnames=("block_b",))
def subclf_forward(x, w1, b1, w2, b2, *, block_b=DEFAULT_BLOCK_B):
    """x: (B, 512) f32 or bf16.  w1: (512, 32), b1: (32,), w2: (32, 1), b2: (1,)."""
    B = x.shape[0]
    # No jnp.pad: a full-array pad to a tile multiple would materialize a
    # second copy of x in HBM (and this kernel is purely HBM-read bound on x).
    # Instead the grid is cdiv(B, tb) and we rely on Pallas's ragged
    # last-block handling: rows >= B in the final tile compute on unspecified
    # VMEM contents; their (row-independent) outputs are sliced off below and
    # never reduced over.
    tb = block_b if B >= block_b else B   # single full-array block for small B
    nt = pl.cdiv(B, tb)

    w1 = w1.astype(x.dtype)               # tiny; lets a bf16 producer feed bf16 fc1
    b1_2d = b1.reshape(1, HIDDEN).astype(jnp.float32)
    w2_row = w2.reshape(1, HIDDEN).astype(jnp.float32)   # (32, 1) -> (1, 32)
    b2_2d = b2.reshape(1, OUT_FEATURES).astype(jnp.float32)

    # VMEM budget: double-buffered x tile + lane-dense out tile + weights,
    # with a 32 MiB floor (safe on v5e/v6e/v7x at the default tile) and a cap
    # so oversized caller-chosen tiles fail loudly at compile time.
    itemsize = jnp.dtype(x.dtype).itemsize
    need = 2 * (tb * IN_FEATURES * itemsize        # x double buffer
                + 8 * tb * 4                        # (1, 1, tb) out, sublane-padded
                + IN_FEATURES * HIDDEN * itemsize   # w1 (double-buffered bound)
                + 4 * 128 * 4)                      # small biases / w2
    vmem_limit = min(max(32 * 1024 * 1024, int(need * 1.25)), 100 * 1024 * 1024)

    out = pl.pallas_call(
        _subclf_kernel,
        out_shape=jax.ShapeDtypeStruct((nt, 1, tb), jnp.float32),
        grid_spec=pltpu.PrefetchScalarGridSpec(
            num_scalar_prefetch=0,
            grid=(nt,),
            in_specs=[
                # x tiled along the batch -> automatic double-buffered prefetch
                # overlaps the HBM DMA of tile i+1 with compute on tile i.
                # (pipeline_mode=pl.Buffered(3) is worth a measured sweep on
                # v7x once tile sizes are final; left at the default depth 2.)
                pl.BlockSpec((tb, IN_FEATURES), lambda i: (i, 0)),
                # Weights/biases: constant block index -> fetched once and kept
                # VMEM-resident across the whole grid.
                pl.BlockSpec((IN_FEATURES, HIDDEN), lambda i: (0, 0)),
                pl.BlockSpec((1, HIDDEN), lambda i: (0, 0)),
                pl.BlockSpec((1, HIDDEN), lambda i: (0, 0)),
                pl.BlockSpec((1, OUT_FEATURES), lambda i: (0, 0)),
            ],
            # Lane-dense output: one (1, tb) row per grid step instead of a
            # (tb, 1) column (which wastes 128x output VMEM and emits masked
            # single-lane stores).
            out_specs=pl.BlockSpec((1, 1, tb), lambda i: (i, 0, 0)),
        ),
        compiler_params=pltpu.CompilerParams(
            # Batch tiles are independent -> "parallel" lets Mosaic shard the
            # grid across both TensorCores on v7x; neutral on v5e/v6e.
            dimension_semantics=("parallel",),
            vmem_limit_bytes=vmem_limit,
        ),
    )(x, w1, b1_2d, w2_row, b2_2d)
    # (nt, 1, tb) -> (B, 1); drops the ragged-tail garbage rows (cheap: 4 B/row
    # vs. the 2 KiB/row copy the old jnp.pad path did on x).
    return out.reshape(nt * tb)[:B].reshape(B, OUT_FEATURES)


def init_params(key):
    """Deterministic init matching PyTorch nn.Linear default (uniform +/- 1/sqrt(fan_in))."""
    k1, k2, k3, k4 = jax.random.split(key, 4)
    bound1 = 1.0 / (IN_FEATURES ** 0.5)
    bound2 = 1.0 / (HIDDEN ** 0.5)
    # Stored already transposed vs PyTorch ((in, out) instead of (out, in))
    # so the kernel does a plain x @ W.
    w1 = jax.random.uniform(k1, (IN_FEATURES, HIDDEN), jnp.float32, -bound1, bound1)
    b1 = jax.random.uniform(k2, (HIDDEN,), jnp.float32, -bound1, bound1)
    w2 = jax.random.uniform(k3, (HIDDEN, OUT_FEATURES), jnp.float32, -bound2, bound2)
    b2 = jax.random.uniform(k4, (OUT_FEATURES,), jnp.float32, -bound2, bound2)
    return w1, b1, w2, b2


def reference_forward(x, w1, b1, w2, b2):
    h = x @ w1 + b1
    h = jnp.where(h > 0, h, LEAK * h)
    y = h @ w2 + b2
    return jax.nn.sigmoid(y)


if __name__ == "__main__":
    key = jax.random.PRNGKey(0)
    kx, kp, kx2 = jax.random.split(key, 3)
    w1, b1, w2, b2 = init_params(kp)

    # Small-shape check (B=2): single block equal to the full array (no pad,
    # no raggedness, no wasted rows).
    B = 2
    x = jax.random.normal(kx, (B, IN_FEATURES), jnp.float32)
    out = jax.block_until_ready(subclf_forward(x, w1, b1, w2, b2))
    ref = reference_forward(x, w1, b1, w2, b2)
    assert out.shape == (B, OUT_FEATURES)
    assert jnp.allclose(out, ref, atol=1e-5, rtol=1e-5), (out, ref)

    # Multi-tile check: grid > 1 with a ragged batch (exercises the pad-free
    # cdiv grid, the ragged last block and the lane-dense output layout).
    B2 = 1029
    x2 = jax.random.normal(kx2, (B2, IN_FEATURES), jnp.float32)
    out2 = jax.block_until_ready(subclf_forward(x2, w1, b1, w2, b2, block_b=512))
    ref2 = reference_forward(x2, w1, b1, w2, b2)
    assert out2.shape == (B2, OUT_FEATURES)
    assert jnp.allclose(out2, ref2, atol=1e-5, rtol=1e-5)

    # bf16-producer path for fc1 (halves the HBM read of x, the only real
    # cost); tolerance relaxed vs. the f32 reference per the classification
    # head sign-off note.
    x2_bf16 = x2.astype(jnp.bfloat16)
    out3 = jax.block_until_ready(subclf_forward(x2_bf16, w1, b1, w2, b2, block_b=512))
    ref3 = reference_forward(x2_bf16.astype(jnp.float32), w1, b1, w2, b2)
    assert out3.shape == (B2, OUT_FEATURES)
    assert jnp.allclose(out3, ref3, atol=2e-2, rtol=2e-2)

    print("KERNEL_OK")
</pallas_src>

<mosaic_0001>
module attributes {stable_mosaic.version = 11 : i64} {
  func.func @_subclf_kernel(%arg0: i32, %arg1: memref<2x512xf32, #tpu.memory_space<vmem>>, %arg2: memref<512x32xf32, #tpu.memory_space<vmem>>, %arg3: memref<1x32xf32, #tpu.memory_space<vmem>>, %arg4: memref<1x32xf32, #tpu.memory_space<vmem>>, %arg5: memref<1x1xf32, #tpu.memory_space<vmem>>, %arg6: memref<1x1x2xf32, #tpu.memory_space<vmem>>) attributes {dimension_semantics = [#tpu.dimension_semantics<parallel>], iteration_bounds = array<i64: 1>, scalar_prefetch = 0 : i64, scratch_operands = 0 : i64, tpu.core_type = #tpu.core_type<tc>, window_params = [{transform_indices = @transform_0, window_bounds = array<i64: 2, 512>}, {pipeline_mode = #tpu.pipeline_mode<synchronous>, transform_indices = @transform_1, window_bounds = array<i64: 512, 32>}, {pipeline_mode = #tpu.pipeline_mode<synchronous>, transform_indices = @transform_2, window_bounds = array<i64: 1, 32>}, {pipeline_mode = #tpu.pipeline_mode<synchronous>, transform_indices = @transform_3, window_bounds = array<i64: 1, 32>}, {pipeline_mode = #tpu.pipeline_mode<synchronous>, transform_indices = @transform_4, window_bounds = array<i64: 1, 1>}, {transform_indices = @transform_5, window_bounds = array<i64: 1, 1, 2>}]} {
    %c0 = arith.constant 0 : index
    %c0_0 = arith.constant 0 : index
    %0 = vector.load %arg1[%c0, %c0_0] : memref<2x512xf32, #tpu.memory_space<vmem>>, vector<2x512xf32>
    %c0_1 = arith.constant 0 : index
    %c0_2 = arith.constant 0 : index
    %1 = vector.load %arg2[%c0_1, %c0_2] : memref<512x32xf32, #tpu.memory_space<vmem>>, vector<512x32xf32>
    %cst = arith.constant dense<0.000000e+00> : vector<2x32xf32>
    %2 = tpu.matmul %0, %1, %cst {dimension_numbers = #tpu.dot_dimension_numbers<[1], [0], [0], [1], [0, 0, 1, 1], [], []>} : vector<2x512xf32>, vector<512x32xf32>, vector<2x32xf32> -> vector<2x32xf32>
    %c0_3 = arith.constant 0 : index
    %c0_4 = arith.constant 0 : index
    %3 = vector.load %arg3[%c0_3, %c0_4] : memref<1x32xf32, #tpu.memory_space<vmem>>, vector<1x32xf32>
    %4 = vector.broadcast %3 : vector<1x32xf32> to vector<2x32xf32>
    %5 = arith.addf %2, %4 : vector<2x32xf32>
    %cst_5 = arith.constant 0.000000e+00 : f32
    %6 = vector.broadcast %cst_5 : f32 to vector<2x32xf32>
    %7 = arith.cmpf ogt, %5, %6 : vector<2x32xf32>
    %cst_6 = arith.constant 2.000000e-01 : f32
    %8 = vector.broadcast %cst_6 : f32 to vector<2x32xf32>
    %9 = arith.mulf %8, %5 : vector<2x32xf32>
    %10 = arith.select %7, %5, %9 : vector<2x32xi1>, vector<2x32xf32>
    %c0_7 = arith.constant 0 : index
    %c0_8 = arith.constant 0 : index
    %11 = vector.load %arg4[%c0_7, %c0_8] : memref<1x32xf32, #tpu.memory_space<vmem>>, vector<1x32xf32>
    %cst_9 = arith.constant dense<0.000000e+00> : vector<1x2xf32>
    %12 = tpu.matmul %11, %10, %cst_9 {dimension_numbers = #tpu.dot_dimension_numbers<[1], [1], [0], [0], [0, 0, 1, 0], [], []>} : vector<1x32xf32>, vector<2x32xf32>, vector<1x2xf32> -> vector<1x2xf32>
    %c0_10 = arith.constant 0 : index
    %c0_11 = arith.constant 0 : index
    %13 = vector.load %arg5[%c0_10, %c0_11] : memref<1x1xf32, #tpu.memory_space<vmem>>, vector<1x1xf32>
    %14 = vector.broadcast %13 : vector<1x1xf32> to vector<1x2xf32>
    %15 = arith.addf %12, %14 : vector<1x2xf32>
    %cst_12 = arith.constant 0.000000e+00 : f32
    %16 = vector.broadcast %cst_12 : f32 to vector<1x2xf32>
    %17 = arith.subf %16, %15 : vector<1x2xf32>
    %18 = math.exp %17 : vector<1x2xf32>
    %cst_13 = arith.constant 1.000000e+00 : f32
    %19 = vector.broadcast %cst_13 : f32 to vector<1x2xf32>
    %20 = arith.addf %19, %18 : vector<1x2xf32>
    %cst_14 = arith.constant 1.000000e+00 : f32
    %21 = vector.broadcast %cst_14 : f32 to vector<1x2xf32>
    %22 = arith.divf %21, %20 : vector<1x2xf32>
    %23 = vector.shape_cast %22 : vector<1x2xf32> to vector<1x1x2xf32>
    %c0_15 = arith.constant 0 : index
    %c0_16 = arith.constant 0 : index
    %c0_17 = arith.constant 0 : index
    %24 = vector.load %arg6[%c0_15, %c0_16, %c0_17] : memref<1x1x2xf32, #tpu.memory_space<vmem>>, vector<1x1x2xf32>
    tpu.vector_store %arg6[%c0_15, %c0_16, %c0_17], %23 {strides = array<i32>} : memref<1x1x2xf32, #tpu.memory_space<vmem>>, vector<1x1x2xf32>,
    return
  }
  func.func @transform_0(%arg0: i32) -> (i32, i32) {
    %c0_i32 = arith.constant 0 : i32
    %c0_i32_0 = arith.constant 0 : i32
    return %arg0, %c0_i32 : i32, i32
  }
  func.func @transform_1(%arg0: i32) -> (i32, i32) {
    %c0_i32 = arith.constant 0 : i32
    %c0_i32_0 = arith.constant 0 : i32
    %c0_i32_1 = arith.constant 0 : i32
    return %c0_i32, %c0_i32_0 : i32, i32
  }
  func.func @transform_2(%arg0: i32) -> (i32, i32) {
    %c0_i32 = arith.constant 0 : i32
    %c0_i32_0 = arith.constant 0 : i32
    %c0_i32_1 = arith.constant 0 : i32
    return %c0_i32, %c0_i32_0 : i32, i32
  }
  func.func @transform_3(%arg0: i32) -> (i32, i32) {
    %c0_i32 = arith.constant 0 : i32
    %c0_i32_0 = arith.constant 0 : i32
    %c0_i32_1 = arith.constant 0 : i32
    return %c0_i32, %c0_i32_0 : i32, i32
  }
  func.func @transform_4(%arg0: i32) -> (i32, i32) {
    %c0_i32 = arith.constant 0 : i32
    %c0_i32_0 = arith.constant 0 : i32
    %c0_i32_1 = arith.constant 0 : i32
    return %c0_i32, %c0_i32_0 : i32, i32
  }
  func.func @transform_5(%arg0: i32) -> (i32, i32, i32) {
    %c0_i32 = arith.constant 0 : i32
    %c0_i32_0 = arith.constant 0 : i32
    %c0_i32_1 = arith.constant 0 : i32
    return %arg0, %c0_i32, %c0_i32_0 : i32, i32, i32
  }
}

</mosaic_0001>

<bundles_post_ra>
// kernel: subclf_forward.1
= control target key start
LH: loop header
LB: loop body
LE: loop exit
PB: predicated region body
PF: predicated region fallthrough
CT: control target
= control target key end

     0   :  { %s532_s0 = inlined_call_operand.vmem [shape: f32[2,512], index: 0, kind: input, shape index: {}]   ;;  %s533_s1 = inlined_call_operand.vmem [shape: f32[512,32], index: 1, kind: input, shape index: {}]   ;;  %s534_s2 = inlined_call_operand.vmem [shape: f32[1,32], index: 2, kind: input, shape index: {}]   ;;  %s535_s3 = inlined_call_operand.vmem [shape: f32[1,32], index: 3, kind: input, shape index: {}]   ;;  %s536_s4 = inlined_call_operand.<no memory space> [shape: f32[1,1], index: 4, kind: input, shape index: {}]   ;;  %s537_s5 = inlined_call_operand.hbm [shape: f32[1,1,2], index: 5, kind: output, shape index: {}]  }
   0x1   :  { %v10_v0 = vstv %s536_s4 }
   0x2   :  { %11 = vst [vmem:[#allocation2] sm:$0x1] %v10_v0 }
   0x3   :  { %v71_v1 = vld [vmem:[%s533_s1 + $0x178] sm:$0xff]  ;;  %v70_v3 = vld [vmem:[%s533_s1 + $0x170] sm:$0xff]  ;;  %v69_v7 = vld [vmem:[%s533_s1 + $0x168] sm:$0xff] }
   0x4   :  { %v39_v2 = vld [vmem:[%s533_s1 + $0x78] sm:$0xff]  ;;  %142 = vmatpush.msra.mxu2 %v71_v1  ;;  %v38_v5 = vld [vmem:[%s533_s1 + $0x70] sm:$0xff]  ;;  %v37_v9 = vld [vmem:[%s533_s1 + $0x68] sm:$0xff] }
   0x5   :  { %102 = vmatpush.msra.mxu0 %v39_v2  ;;  %v87_v4 = vld [vmem:[%s533_s1 + $0x1f8] sm:$0xff]  ;;  %v86_v8 = vld [vmem:[%s533_s1 + $0x1f0] sm:$0xff]  ;;  %v85_v11 = vld [vmem:[%s533_s1 + $0x1e8] sm:$0xff] }
   0x6   :  { %v55_v6 = vld [vmem:[%s533_s1 + $0xf8] sm:$0xff]  ;;  %162 = vmatpush.msra.mxu3 %v87_v4  ;;  %143 = vmatpush.msra.mxu2 %v70_v3  ;;  %v54_v10 = vld [vmem:[%s533_s1 + $0xf0] sm:$0xff]  ;;  %v68_v12 = vld [vmem:[%s533_s1 + $0x160] sm:$0xff] }
   0x7   :  { %122 = vmatpush.msra.mxu1 %v55_v6  ;;  %103 = vmatpush.msra.mxu0 %v38_v5  ;;  %v36_v13 = vld [vmem:[%s533_s1 + $0x60] sm:$0xff]  ;;  %v53_v14 = vld [vmem:[%s533_s1 + $0xe8] sm:$0xff]  ;;  %v67_v17 = vld [vmem:[%s533_s1 + $0x158] sm:$0xff] }
   0x8   :  { %163 = vmatpush.msra.mxu3 %v86_v8  ;;  %144 = vmatpush.msra.mxu2 %v69_v7  ;;  %v84_v15 = vld [vmem:[%s533_s1 + $0x1e0] sm:$0xff]  ;;  %v35_v18 = vld [vmem:[%s533_s1 + $0x58] sm:$0xff]  ;;  %v66_v21 = vld [vmem:[%s533_s1 + $0x150] sm:$0xff] }
   0x9   :  { %123 = vmatpush.msra.mxu1 %v54_v10  ;;  %104 = vmatpush.msra.mxu0 %v37_v9  ;;  %v52_v16 = vld [vmem:[%s533_s1 + $0xe0] sm:$0xff]  ;;  %v83_v19 = vld [vmem:[%s533_s1 + $0x1d8] sm:$0xff]  ;;  %v34_v22 = vld [vmem:[%s533_s1 + $0x50] sm:$0xff] }
   0xa   :  { %164 = vmatpush.msra.mxu3 %v85_v11  ;;  %145 = vmatpush.msra.mxu2 %v68_v12  ;;  %v51_v20 = vld [vmem:[%s533_s1 + $0xd8] sm:$0xff]  ;;  %v82_v23 = vld [vmem:[%s533_s1 + $0x1d0] sm:$0xff]  ;;  %v65_v25 = vld [vmem:[%s533_s1 + $0x148] sm:$0xff] }
   0xb   :  { %124 = vmatpush.msra.mxu1 %v53_v14  ;;  %105 = vmatpush.msra.mxu0 %v36_v13  ;;  %v50_v24 = vld [vmem:[%s533_s1 + $0xd0] sm:$0xff]  ;;  %v33_v26 = vld [vmem:[%s533_s1 + $0x48] sm:$0xff]  ;;  %v64_v29 = vld [vmem:[%s533_s1 + $0x140] sm:$0xff] }
   0xc   :  { %165 = vmatpush.msra.mxu3 %v84_v15  ;;  %146 = vmatpush.msra.mxu2 %v67_v17  ;;  %v81_v27 = vld [vmem:[%s533_s1 + $0x1c8] sm:$0xff]  ;;  %v32_v30 = vld [vmem:[%s533_s1 + $0x40] sm:$0xff]  ;;  %v63_v33 = vld [vmem:[%s533_s1 + $0x138] sm:$0xff] }
   0xd   :  { %125 = vmatpush.msra.mxu1 %v52_v16  ;;  %106 = vmatpush.msra.mxu0 %v35_v18  ;;  %v49_v28 = vld [vmem:[%s533_s1 + $0xc8] sm:$0xff]  ;;  %v80_v31 = vld [vmem:[%s533_s1 + $0x1c0] sm:$0xff]  ;;  %v31_v34 = vld [vmem:[%s533_s1 + $0x38] sm:$0xff] }
   0xe   :  { %166 = vmatpush.msra.mxu3 %v83_v19  ;;  %147 = vmatpush.msra.mxu2 %v66_v21  ;;  %v48_v32 = vld [vmem:[%s533_s1 + $0xc0] sm:$0xff]  ;;  %v79_v35 = vld [vmem:[%s533_s1 + $0x1b8] sm:$0xff]  ;;  %v62_v37 = vld [vmem:[%s533_s1 + $0x130] sm:$0xff] }
   0xf   :  { %126 = vmatpush.msra.mxu1 %v51_v20  ;;  %107 = vmatpush.msra.mxu0 %v34_v22  ;;  %v47_v36 = vld [vmem:[%s533_s1 + $0xb8] sm:$0xff]  ;;  %v30_v38 = vld [vmem:[%s533_s1 + $0x30] sm:$0xff]  ;;  %v61_v41 = vld [vmem:[%s533_s1 + $0x128] sm:$0xff] }
  0x10   :  { %167 = vmatpush.msra.mxu3 %v82_v23  ;;  %148 = vmatpush.msra.mxu2 %v65_v25  ;;  %v78_v39 = vld [vmem:[%s533_s1 + $0x1b0] sm:$0xff]  ;;  %v29_v42 = vld [vmem:[%s533_s1 + $0x28] sm:$0xff]  ;;  %v60_v45 = vld [vmem:[%s533_s1 + $0x120] sm:$0xff] }
  0x11   :  { %127 = vmatpush.msra.mxu1 %v50_v24  ;;  %108 = vmatpush.msra.mxu0 %v33_v26  ;;  %v46_v40 = vld [vmem:[%s533_s1 + $0xb0] sm:$0xff]  ;;  %v77_v43 = vld [vmem:[%s533_s1 + $0x1a8] sm:$0xff]  ;;  %v28_v46 = vld [vmem:[%s533_s1 + $0x20] sm:$0xff] }
  0x12   :  { %168 = vmatpush.msra.mxu3 %v81_v27  ;;  %149 = vmatpush.msra.mxu2 %v64_v29  ;;  %v45_v44 = vld [vmem:[%s533_s1 + $0xa8] sm:$0xff]  ;;  %v23_v47 = vld [vmem:[%s532_s0] sm:$0xff]  ;;  %v59_v50 = vld [vmem:[%s533_s1 + $0x118] sm:$0xff] }
  0x13   :  { %128 = vmatpush.msra.mxu1 %v49_v28  ;;  %109 = vmatpush.msra.mxu0 %v32_v30  ;;  %v76_v48 = vld [vmem:[%s533_s1 + $0x1a0] sm:$0xff]  ;;  %93 = vst [vmem:[#allocation1] ss:$4 sm:$0xff] %v23_v47  ;;  %v27_v51 = vld [vmem:[%s533_s1 + $0x18] sm:$0xff] }
  0x14   :  { %169 = vmatpush.msra.mxu3 %v80_v31  ;;  %150 = vmatpush.msra.mxu2 %v63_v33  ;;  %v44_v49 = vld [vmem:[%s533_s1 + $0xa0] sm:$0xff] }
  0x15   :  { %129 = vmatpush.msra.mxu1 %v48_v32  ;;  %110 = vmatpush.msra.mxu0 %v31_v34 }
  0x16   :  { %170 = vmatpush.msra.mxu3 %v79_v35  ;;  %151 = vmatpush.msra.mxu2 %v62_v37 }
  0x17   :  { %130 = vmatpush.msra.mxu1 %v47_v36  ;;  %111 = vmatpush.msra.mxu0 %v30_v38 }
  0x18   :  { %171 = vmatpush.msra.mxu3 %v78_v39  ;;  %152 = vmatpush.msra.mxu2 %v61_v41 }
  0x19   :  { %131 = vmatpush.msra.mxu1 %v46_v40  ;;  %112 = vmatpush.msra.mxu0 %v29_v42 }
  0x1a   :  { %172 = vmatpush.msra.mxu3 %v77_v43 }
  0x1b   :  { %132 = vmatpush.msra.mxu1 %v45_v44 }
  0x1c   :  { %12 = vsyncpa [#allocation4], 0  ;;  %153 = vmatpush.msra.mxu2 %v60_v45  ;;  %113 = vmatpush.msra.mxu0 %v28_v46  ;;  %v75_v52 = vld [vmem:[%s533_s1 + $0x198] sm:$0xff]  ;;  %v58_v54 = vld [vmem:[%s533_s1 + $0x110] sm:$0xff]  ;;  %v293_v7 = vmov 0   ;;  %vm193_vm1 = vcmask 261120  }
  0x1d   :  { %v43_v53 = vld [vmem:[%s533_s1 + $0x98] sm:$0xff]  ;;  %173 = vmatpush.msra.mxu3 %v76_v48  ;;  %133 = vmatpush.msra.mxu1 %v44_v49  ;;  %v26_v55 = vld [vmem:[%s533_s1 + $0x10] sm:$0xff]  ;;  %v57_v58 = vld [vmem:[%s533_s1 + $0x108] sm:$0xff]  ;;  %s248_s23 = sshll.u32 %s537_s5, 4  ;;  %vm239_vm5 = vcmask 8192   ;;  %s249_s23 = int_to_ptr.hbm [resolvable:$true] %s248_s23 }
  0x1e   :  { %154 = vmatpush.msra.mxu2 %v59_v50  ;;  %114 = vmatpush.msra.mxu0 %v27_v51  ;;  %v74_v56 = vld [vmem:[%s533_s1 + $0x190] sm:$0xff]  ;;  %v25_v59 = vld [vmem:[%s533_s1 + $0x8] sm:$0xff]  ;;  %v56_v62 = vld [vmem:[%s533_s1 + $0x100] sm:$0xff] }
  0x1f   :  { %v42_v57 = vld [vmem:[%s533_s1 + $0x90] sm:$0xff]  ;;  %174 = vmatpush.msra.mxu3 %v75_v52  ;;  %134 = vmatpush.msra.mxu1 %v43_v53  ;;  %v73_v60 = vld [vmem:[%s533_s1 + $0x188] sm:$0xff]  ;;  %v24_v63 = vld [vmem:[%s533_s1] sm:$0xff] }
  0x20   :  { %155 = vmatpush.msra.mxu2 %v58_v54  ;;  %115 = vmatpush.msra.mxu0 %v26_v55  ;;  %v41_v61 = vld [vmem:[%s533_s1 + $0x88] sm:$0xff]  ;;  %v96_v0 = vld.sshfl [vmem:[#allocation1 + $0x10] sm:$0xff pattern:$0x73625140]  ;;  %v72_v1 = vld [vmem:[%s533_s1 + $0x180] sm:$0xff] }
  0x21   :  { %175 = vmatpush.msra.mxu3 %v74_v56  ;;  %135 = vmatpush.msra.mxu1 %v42_v57  ;;  %v94_v2 = vld.sshfl [vmem:[#allocation1] sm:$0xff pattern:$0x73625140]  ;;  %v97_v3 = vld.sshfl [vmem:[#allocation1 + $0x18] sm:$0xff pattern:$0x73625140] }
  0x22   :  { %156 = vmatpush.msra.mxu2 %v57_v58  ;;  %116 = vmatpush.msra.mxu0 %v25_v59  ;;  %v40_v4 = vld [vmem:[%s533_s1 + $0x80] sm:$0xff]  ;;  %v95_v5 = vld.sshfl [vmem:[#allocation1 + $0x8] sm:$0xff pattern:$0x73625140] }
  0x23   :  { %176 = vmatpush.msra.mxu3 %v73_v60  ;;  %136 = vmatpush.msra.mxu1 %v41_v61  ;;  %v186_v6 = vld [vmem:[#allocation2] sm:$0x1]  ;;  %v262_v8 = vld [vmem:[%s534_s2] ss:$0 sm:$0xff]  ;;  %s294_s2 = smov [#allocation3]  }
  0x24   :  { %157 = vmatpush.msra.mxu2 %v56_v62  ;;  %117 = vmatpush.msra.mxu0 %v24_v63  ;;  %v185_v19 = vld [vmem:[%s535_s3] sm:$0x1]  ;;  %s246_s3 = sshll.u32 %s294_s2, 4  ;;  %s247_s3 = int_to_ptr.vmem [resolvable:$true] %s246_s3 }
  0x25   :  { %158 = vmatmul.f32.vlgmr.msra.gmra.mxu2 %v96_v0  ;;  %177 = vmatpush.msra.mxu3 %v72_v1 }
  0x26   :  { %118 = vmatmul.f32.vlgmr.msra.gmra.mxu0 %v94_v2  ;;  %178 = vmatmul.f32.vlgmr.msra.gmra.mxu3 %v97_v3 }
  0x27   :  { %137 = vmatpush.msra.mxu1 %v40_v4  ;;  %261 = vset.pattern.permute.xlu0 %v293_v7 }
  0x28   :  { %138 = vmatmul.f32.vlgmr.msra.gmra.mxu1 %v95_v5  ;;  %189 = vperm.xlu0 %261, %v186_v6  }
  0x9a   :  { %v190_v20 = vpop.permute.xlu0 %189 }
  0x9b   :  { %v192_v21 = vperm.slane %v190_v20, 0 }
  0xa3   :  { %v119_v9 = vpop.f32.mrf.mxu0 }
  0xa4   :  { %v120_v10 = vadd.f32 %v262_v8, %v119_v9 }
  0xa5   :  { %v139_v11 = vpop.f32.mrf.mxu1 }
  0xa6   :  { %v140_v12 = vadd.f32 %v139_v11, %v120_v10 }
  0xa8   :  { %v159_v13 = vpop.f32.mrf.mxu2 }
  0xa9   :  { %v160_v14 = vadd.f32 %v159_v13, %v140_v12  ;;  %v179_v15 = vpop.f32.mrf.mxu3 }
  0xab   :  { %v180_v16 = vadd.f32 %v179_v15, %v160_v14 }
  0xad   :  { %v183_v17 = vmul.f32 0.2, %v180_v16  ;;  %vm182_vm0 = vcmp.gt.f32.partialorder %v180_v16, 0.0 }
  0xaf   :  { %v184_v18 = vsel %vm182_vm0, %v180_v16, %v183_v17 }
  0xb0   :  { %257 = vmatpush.xpose.msk.msrb.mxu0 %vm193_vm1, %v184_v18 }
  0xb3   :  { %258 = vmatmul.msk.f32.vlgmr.msrb.gmra.mxu0 %vm193_vm1, %v185_v19 }
 0x130   :  { %v217_v22 = vpop.f32.mrf.mxu0 }
 0x131   :  { %v218_v23 = vadd.f32 %v217_v22, %v192_v21 }
 0x133   :  { %v220_v24 = vsub.f32 0.0, %v218_v23 }
 0x135   :  { %v221_v25 = vmul.f32 1.442695, %v220_v24 }
 0x137   :  { %263 = vpow2.f32 %v221_v25 }
 0x13d   :  { %v264_v26 = vpop.eup %263 }
 0x13e   :  { %v223_v27 = vadd.f32 1.0, %v264_v26 }
 0x140   :  { %265 = vrcp.f32 %v223_v27  ;;  %v235_v31 = vand.u32 2147483648, %v223_v27  ;;  %v233_v33 = vand.u32 2147483647, %v223_v27  ;;  %vm229_vm3 = vweird.f32 %v223_v27 }
 0x142   :  { %v236_v35 = vor.u32 1.1754944e-38, %v235_v31  ;;  %vm234_vm6 = vcmp.eq.f32.partialorder %v233_v33, 8.507059e+37 }
 0x146   :  { %v266_v28 = vpop.eup %265 }
 0x147   :  { %v225_v29 = vmul.f32 %v266_v28, %v223_v27  ;;  %vm230_vm2 = vweird.f32 %v266_v28 }
 0x148   :  { %vm231_vm4 = vmor %vm229_vm3, %vm230_vm2 }
 0x149   :  { %v226_v30 = vsub.f32 1.0, %v225_v29 }
 0x14b   :  { %v227_v32 = vmul.f32 %v266_v28, %v226_v30 }
 0x14d   :  { %v228_v34 = vadd.f32 %v266_v28, %v227_v32 }
 0x14f   :  { %v232_v36 = vsel %vm231_vm4, %v266_v28, %v228_v34 }
 0x150   :  { %v237_v37 = vsel %vm234_vm6, %v236_v35, %v232_v36 }
 0x151   :  { %240 = vst.msk [vmem:[#allocation3] sm:$0x1] %vm239_vm5, %v237_v37 }
 0x152   :  { %251 = dma.vmem_to_hbm [thread:$0]  %s247_s3, 16, %s249_s23, [#allocation4]  }
 0x153   :  { %291 = dma.done.wait [#allocation4], 16  }
 0x154   :  { %292 = vsyncadd [#allocation4], 4294967280 }
 0x155   :  { %256 = vsyncpa [#allocation4], 1 }

</bundles_post_ra>
